<compile_context>
chip_gen: v5e
topology: v5e:2x2
jax: 0.10.0
libtpu: 0.0.40
codegen_flags: <defaults>
</compile_context>

<pallas_src>
import numpy as np
import jax
import jax.numpy as jnp
from jax import lax
from jax.experimental import pallas as pl
from jax.experimental.pallas import tpu as pltpu

N, C, H, W = 1, 1024, 14, 14
G = 32                      # groups
CIN_G = C // G              # 32 input channels per group
COUT_G = C // G             # 32 output channels per group
K = 3
KK = K * K
EPS = 1e-5
HW = H * W                  # 196
GB = 16                     # groups per grid step -> grid = (2,)
TAPS = tuple((kh - 1, kw - 1) for kh in range(K) for kw in range(K))


def _probe_roll_matches_jnp():
    """True iff pltpu.roll(x, s) == jnp.roll(x, s) (result[i] = x[i - s]).

    Probed once with a tiny eager pallas_call so the static tap shifts below are
    correct on any jax/Mosaic version; costs a few microseconds at setup.
    """
    def k(x_ref, o_ref):
        o_ref[...] = pltpu.roll(x_ref[...], 1, axis=1)

    x = jnp.broadcast_to(jnp.arange(128, dtype=jnp.float32), (8, 128))
    y = pl.pallas_call(k, out_shape=jax.ShapeDtypeStruct((8, 128), jnp.float32))(x)
    return int(y[0, 1]) == 0


_ROLL_MATCHES_JNP = _probe_roll_matches_jnp()


def _left_rot_shift(s):
    """Static pltpu.roll shift so result[n] = x[(n + s) % HW]."""
    return ((-s) if _ROLL_MATCHES_JNP else s) % HW


def _tap_masks():
    """(KK, 1, HW) bf16 {0,1} masks: valid output positions for each 3x3 tap."""
    m = np.zeros((KK, H, W), np.float32)
    for t, (dh, dw) in enumerate(TAPS):
        hs, he = max(0, -dh), min(H, H - dh)
        ws, we = max(0, -dw), min(W, W - dw)
        m[t, hs:he, ws:we] = 1.0
    return jnp.asarray(m.reshape(KK, 1, HW), dtype=jnp.bfloat16)


def fused_kernel(x_ref, w_ref, mask_ref, gamma_ref, beta_ref, o_ref):
    # x_ref     : (GB, CIN_G, HW)              f32   pre-ReLU input, GB groups
    # w_ref     : (GB, K, COUT_G, K*CIN_G)     bf16  per-kernel-row weight slabs
    # mask_ref  : (KK, 1, HW)                  bf16  per-tap validity masks (resident)
    # gamma_ref : (GB, COUT_G, 1)              f32
    # beta_ref  : (GB, COUT_G, 1)              f32
    # o_ref     : (GB, COUT_G, HW)             f32
    inv_hw = jnp.float32(1.0 / HW)

    def group_body(g, carry):
        # ReLU once per group, in bf16 (MXU operand dtype).
        xg = jnp.maximum(x_ref[g].astype(jnp.bfloat16), 0.0)        # (CIN_G, HW)

        def tap(dh, dw):
            # tap[c, n] = relu(x)[c, n + dh*W + dw], zeroed where the 3x3
            # window falls outside the image (reproduces pad=1).
            s = dh * W + dw
            v = xg if s == 0 else pltpu.roll(xg, _left_rot_shift(s), axis=1)
            if (dh, dw) != (0, 0):
                t = (dh + 1) * K + (dw + 1)
                v = v * mask_ref[t]                                  # (1, HW) bcast
            return v

        # Grouped 3x3 conv: one (COUT_G, 96) x (96, HW) MXU matmul per kernel
        # row (K=96 stays a single contraction pass), f32 accumulation.  The
        # row stacks stay register-resident -- no im2col scratch round trip.
        acc = None
        for r in range(K):                                           # dh = r - 1
            stack = jnp.concatenate([tap(r - 1, dw) for dw in (-1, 0, 1)],
                                    axis=0)                          # (96, HW) bf16
            d = jnp.dot(w_ref[g, r], stack,
                        preferred_element_type=jnp.float32)          # (COUT_G, HW)
            acc = d if acc is None else acc + d

        # BatchNorm2d forward, training mode (biased batch variance), all f32.
        mean = jnp.sum(acc, axis=1, keepdims=True) * inv_hw          # (COUT_G, 1)
        msq = jnp.sum(acc * acc, axis=1, keepdims=True) * inv_hw
        var = msq - mean * mean
        inv = lax.rsqrt(var + EPS)
        scale = gamma_ref[g] * inv                                   # (COUT_G, 1)
        o_ref[g] = acc * scale + (beta_ref[g] - mean * scale)
        return carry

    lax.fori_loop(0, GB, group_body, None)
    # TODO(synk): running_mean/running_var momentum updates (module buffer
    # mutation) are not materialized; the forward output is unaffected.


@jax.jit
def relu_groupconv_bn(x, weight, gamma, beta):
    """x: (N,C,H,W) f32, weight: (C, CIN_G, K, K) f32, gamma/beta: (C,) f32."""
    xg = x.astype(jnp.float32).reshape(G, CIN_G, HW)                 # free reshape

    # One-time weight relayout fused with the bf16 cast:
    # (C, CIN_G, kh, kw) -> (G, kh, COUT_G, kw*CIN_G)  (kw-major, cin-minor),
    # matching the in-kernel row stacks.
    wg = (weight.astype(jnp.float32)
          .reshape(G, COUT_G, CIN_G, K, K)
          .transpose(0, 3, 1, 4, 2)
          .reshape(G, K, COUT_G, K * CIN_G)
          .astype(jnp.bfloat16))

    gg = gamma.astype(jnp.float32).reshape(G, COUT_G, 1)
    bg = beta.astype(jnp.float32).reshape(G, COUT_G, 1)
    masks = _tap_masks()                                             # (KK,1,HW) bf16

    out = pl.pallas_call(
        fused_kernel,
        out_shape=jax.ShapeDtypeStruct((G, COUT_G, HW), jnp.float32),
        grid_spec=pltpu.PrefetchScalarGridSpec(
            num_scalar_prefetch=0,
            grid=(G // GB,),
            in_specs=[
                pl.BlockSpec((GB, CIN_G, HW), lambda i: (i, 0, 0)),
                pl.BlockSpec((GB, K, COUT_G, K * CIN_G), lambda i: (i, 0, 0, 0)),
                pl.BlockSpec((KK, 1, HW), lambda i: (0, 0, 0)),      # resident
                pl.BlockSpec((GB, COUT_G, 1), lambda i: (i, 0, 0)),
                pl.BlockSpec((GB, COUT_G, 1), lambda i: (i, 0, 0)),
            ],
            out_specs=pl.BlockSpec((GB, COUT_G, HW), lambda i: (i, 0, 0)),
        ),
        compiler_params=pltpu.CompilerParams(
            dimension_semantics=("parallel",)),
    )(xg, wg, masks, gg, bg)

    return out.reshape(N, C, H, W)


def reference(x, weight, gamma, beta):
    """Pure-JAX f32 reference of the PyTorch forward (training-mode BN)."""
    xr = jnp.maximum(x, 0.0)
    y = jax.lax.conv_general_dilated(
        xr, weight, window_strides=(1, 1), padding=((1, 1), (1, 1)),
        dimension_numbers=("NCHW", "OIHW", "NCHW"),
        feature_group_count=G, precision=jax.lax.Precision.HIGHEST)
    mean = jnp.mean(y, axis=(0, 2, 3), keepdims=True)
    var = jnp.mean((y - mean) ** 2, axis=(0, 2, 3), keepdims=True)
    return ((y - mean) * jax.lax.rsqrt(var + EPS)
            * gamma.reshape(1, C, 1, 1) + beta.reshape(1, C, 1, 1))


if __name__ == "__main__":
    key = jax.random.PRNGKey(0)
    kx, kw, kg, kb = jax.random.split(key, 4)

    # Deterministic synthetic parameters (shapes fixed by the module __init__).
    x = jax.random.normal(kx, (N, C, H, W), dtype=jnp.float32)
    weight = 0.05 * jax.random.normal(kw, (C, CIN_G, K, K), dtype=jnp.float32)
    gamma = 1.0 + 0.1 * jax.random.normal(kg, (C,), dtype=jnp.float32)
    beta = 0.1 * jax.random.normal(kb, (C,), dtype=jnp.float32)

    out = jax.block_until_ready(relu_groupconv_bn(x, weight, gamma, beta))
    ref = jax.block_until_ready(reference(x, weight, gamma, beta))

    assert out.shape == (N, C, H, W)
    # Conv operands are bf16 on the MXU with f32 accumulation; tolerance covers
    # bf16 operand rounding vs. the f32 HIGHEST-precision reference.
    assert jnp.allclose(out, ref, atol=2e-2, rtol=2e-2), (
        float(jnp.max(jnp.abs(out - ref))))

    print("KERNEL_OK")
</pallas_src>

<mosaic_0001>
module attributes {stable_mosaic.version = 11 : i64} {
  func.func @k(%arg0: memref<8x128xf32, #tpu.memory_space<vmem>>, %arg1: memref<8x128xf32, #tpu.memory_space<vmem>>) attributes {dimension_semantics = [], scalar_prefetch = 0 : i64, scratch_operands = 0 : i64, tpu.core_type = #tpu.core_type<tc>} {
    %c0 = arith.constant 0 : index
    %c0_0 = arith.constant 0 : index
    %0 = vector.load %arg0[%c0, %c0_0] : memref<8x128xf32, #tpu.memory_space<vmem>>, vector<8x128xf32>
    %c1_i32 = arith.constant 1 : i32
    %1 = tpu.dynamic_rotate %0 by %c1_i32 dim 1 : vector<8x128xf32>, i32 -> vector<8x128xf32>
    %c0_1 = arith.constant 0 : index
    %c0_2 = arith.constant 0 : index
    %2 = vector.load %arg1[%c0_1, %c0_2] : memref<8x128xf32, #tpu.memory_space<vmem>>, vector<8x128xf32>
    tpu.vector_store %arg1[%c0_1, %c0_2], %1 {strides = array<i32>} : memref<8x128xf32, #tpu.memory_space<vmem>>, vector<8x128xf32>,
    return
  }
}

</mosaic_0001>

<bundles_post_ra>
// kernel: tpu_custom_call.1
= control target key start
LH: loop header
LB: loop body
LE: loop exit
PB: predicated region body
PF: predicated region fallthrough
CT: control target
= control target key end

     0   :  { %6 = vsyncpa [#allocation3], 0  ;;  %s118_s0 = inlined_call_operand.hbm [shape: f32[8,128], index: 0, kind: input, shape index: {}]   ;;  %s119_s1 = inlined_call_operand.hbm [shape: f32[8,128], index: 1, kind: output, shape index: {}]  }
   0x1   :  { %7 = vsyncpa [#allocation4], 0  ;;  %s13_s8 = sshll.u32 %s118_s0, 4  ;;  %s99_s9 = smov [#allocation2]   ;;  %s14_s8 = int_to_ptr.hbm [resolvable:$true] %s13_s8 }
   0x2   :  { %s15_s10 = sshll.u32 %s99_s9, 4  ;;  %s16_s10 = int_to_ptr.vmem [resolvable:$true] %s15_s10 }
   0x3   :  { %18 = dma.hbm_to_vmem [thread:$0]  %s14_s8, 128, %s16_s10, [#allocation3]  }
   0x4   :  { %95 = dma.done.wait [#allocation3], 128  }
   0x5   :  { %96 = vsyncadd [#allocation3], 4294967168  ;;  %v23_v0 = vld [vmem:[#allocation2] sm:$0xff]  ;;  %s100_s11 = smov 1   ;;  %s101_s12 = smov [#allocation5]  }
   0x6   :  { %24 = vrot.lane.b32.xlu0 %v23_v0, %s100_s11  ;;  %s32_s13 = sshll.u32 %s101_s12, 4  ;;  %s34_s16 = sshll.u32 %s119_s1, 4  ;;  %s33_s13 = int_to_ptr.vmem [resolvable:$true] %s32_s13  ;;  %s35_s16 = int_to_ptr.hbm [resolvable:$true] %s34_s16 }
  0x78   :  { %v25_v1 = vpop.permute.xlu0 %24 }
  0x79   :  { %26 = vst [vmem:[#allocation5] sm:$0xff] %v25_v1 }
  0x7a   :  { %37 = dma.vmem_to_hbm [thread:$0]  %s33_s13, 128, %s35_s16, [#allocation4]  }
  0x7b   :  { %97 = dma.done.wait [#allocation4], 128  }
  0x7c   :  { %98 = vsyncadd [#allocation4], 4294967168 }
  0x7d   :  { %42 = vsyncpa [#allocation3], 1 }
  0x7e   :  { %43 = vsyncpa [#allocation4], 1 }

</bundles_post_ra>
